<compile_context>
chip_gen: v6e
topology: v6e:2x2x1
jax: 0.10.0
libtpu: 0.0.40
codegen_flags: <defaults>
</compile_context>

<pallas_src>
import functools

import jax
import jax.numpy as jnp
from jax.experimental import pallas as pl
from jax.experimental.pallas import tpu as pltpu

# ------------------------- configuration (det_cfg stand-in) ------------------
TARGET_H = 16              # det_cfg.DATA.HEIGHT
TARGET_W = 16              # det_cfg.DATA.WIDTH
NUM_CLASSES = 4            # det_cfg.DATA.NUM_CLASSES
HIDDEN = 32                # synthetic detector hidden channels
CIN = 3                    # RGB
K_RAW = CIN * 9            # 27 : flattened 3x3xCIN conv contraction
K_PAD = 32                 # contraction padded to a clean sublane multiple
NUM_OUT = NUM_CLASSES + 4  # merged cls + box channels
MARGIN = 32                # lane margin around the flat canvas, must be >= TARGET_W + 1

assert TARGET_W & (TARGET_W - 1) == 0, "TARGET_W must be a power of two (lane-mask trick)"
assert MARGIN >= TARGET_W + 1

# ImageNet normalization (A.Normalize defaults, max_pixel_value=255), baked as
# compile-time constants:  (x/255 - mean)/std  ==  x * _SCALE + _OFFSET
_MEAN = (0.485, 0.456, 0.406)
_STD = (0.229, 0.224, 0.225)
_SCALE = tuple(1.0 / (255.0 * s) for s in _STD)
_OFFSET = tuple(-m / s for m, s in zip(_MEAN, _STD))


def _per_channel(rows, v0, v1, v2):
    """Per-channel constant along the sublane (channel) axis; CIN == 3."""
    return jnp.where(rows == 0, jnp.float32(v0),
                     jnp.where(rows == 1, jnp.float32(v1), jnp.float32(v2)))


# ------------------------------ fused Pallas kernel --------------------------
def _fused_detector_kernel(x_ref, w1t_ref, b1_ref, wht_ref, bh_ref, out_ref,
                           xbig_ref, patches_ref, *, rows_in, top):
    # x_ref:       (CIN, rows_in*W)  raw image rows, channel-major flat, values 0..255
    # w1t_ref:     (HIDDEN, K_PAD)   3x3 conv weights, row k = 3*(ky*3+kx) + c
    # b1_ref:      (HIDDEN, 1)
    # wht_ref:     (NUM_OUT, HIDDEN) merged cls(4) + box(4) 1x1 heads
    # bh_ref:      (NUM_OUT, 1)
    # out_ref:     (NUM_OUT, H*W)    channel-major, lane-dense (== NCHW layout)
    # xbig_ref:    (CIN, H*W + 2*MARGIN) scratch: normalized padded canvas + zero ring
    # patches_ref: (K_PAD, H*W)      scratch: im2col matrix
    HW = TARGET_H * TARGET_W
    HWB = HW + 2 * MARGIN
    n_in = rows_in * TARGET_W

    # --- PadIfNeeded + Normalize (fused, constants baked) ---------------------
    # Inside the HxW canvas but outside the real image -> PadIfNeeded zeros that
    # become -mean/std after Normalize.  Outside the canvas (lane margin) -> true
    # zeros, which double as the conv's vertical zero padding.
    ch_b = jax.lax.broadcasted_iota(jnp.int32, (CIN, HWB), 0)
    lane_b = jax.lax.broadcasted_iota(jnp.int32, (CIN, HWB), 1)
    p = lane_b - MARGIN
    xbig_ref[...] = jnp.where((p >= 0) & (p < HW),
                              _per_channel(ch_b, *_OFFSET), 0.0)

    ch_i = jax.lax.broadcasted_iota(jnp.int32, (CIN, n_in), 0)
    x_norm = x_ref[...] * _per_channel(ch_i, *_SCALE) + _per_channel(ch_i, *_OFFSET)
    xbig_ref[:, pl.ds(MARGIN + top * TARGET_W, n_in)] = x_norm

    # --- im2col for 3x3 / stride-1 / pad-1 conv, fully in VMEM ----------------
    # Only the K 27->32 padding rows need explicit zeros; rows 0..26 are written below.
    patches_ref[pl.ds(K_RAW, K_PAD - K_RAW), :] = jnp.zeros(
        (K_PAD - K_RAW, HW), jnp.float32)
    lane = jax.lax.broadcasted_iota(jnp.int32, (CIN, HW), 1)
    col = lane & (TARGET_W - 1)                      # column index j (W is a power of 2)
    mask_l = col >= 1                                # valid when reading column j-1
    mask_r = col < TARGET_W - 1                      # valid when reading column j+1
    for dy in (-1, 0, 1):
        for dx in (-1, 0, 1):
            d = dy * TARGET_W + dx
            # Shifted window: flat index p + d; vertical overruns land in the zero
            # margin, horizontal row-wrap is masked explicitly.
            sh = xbig_ref[:, pl.ds(MARGIN + d, HW)]            # (CIN, HW)
            if dx == 1:
                sh = jnp.where(mask_r, sh, 0.0)
            elif dx == -1:
                sh = jnp.where(mask_l, sh, 0.0)
            kidx = (dy + 1) * 3 + (dx + 1)
            patches_ref[pl.ds(CIN * kidx, CIN), :] = sh

    # --- conv-as-matmul -> ReLU -> merged heads (one MXU pass, lane-dense out) -
    h = jnp.dot(w1t_ref[...], patches_ref[...],
                preferred_element_type=jnp.float32) + b1_ref[...]
    h = jnp.maximum(h, 0.0)
    out_ref[...] = jnp.dot(wht_ref[...], h,
                           preferred_element_type=jnp.float32) + bh_ref[...]


def _multi_detector_pallas(x_flat, params, *, rows_in, top):
    HW = TARGET_H * TARGET_W
    kernel = functools.partial(_fused_detector_kernel, rows_in=rows_in, top=top)
    vmem = pl.BlockSpec(memory_space=pltpu.MemorySpace.VMEM)
    return pl.pallas_call(
        kernel,
        out_shape=jax.ShapeDtypeStruct((NUM_OUT, HW), jnp.float32),
        in_specs=[vmem] * 5,
        out_specs=vmem,
        scratch_shapes=[
            pltpu.VMEM((CIN, HW + 2 * MARGIN), jnp.float32),   # padded normalized canvas
            pltpu.VMEM((K_PAD, HW), jnp.float32),              # im2col patches
        ],
    )(x_flat, params["w1t"], params["b1"], params["wht"], params["bh"])


# ------------------------------ params / wrapper ------------------------------
def init_params(key):
    k1, k2, k3 = jax.random.split(key, 3)
    # Conv weight rows ordered k = 3*(ky*3+kx) + c, contraction padded 27 -> 32.
    w1 = jax.random.normal(k1, (K_RAW, HIDDEN), jnp.float32) * 0.1
    w1t = jnp.zeros((HIDDEN, K_PAD), jnp.float32).at[:, :K_RAW].set(w1.T)
    wc = jax.random.normal(k2, (HIDDEN, NUM_CLASSES), jnp.float32) * 0.1
    wr = jax.random.normal(k3, (HIDDEN, 4), jnp.float32) * 0.1
    wht = jnp.concatenate([wc, wr], axis=1).T          # (NUM_OUT, HIDDEN) merged heads
    return dict(
        w1t=w1t,
        b1=jnp.zeros((HIDDEN, 1), jnp.float32),
        wht=wht,
        bh=jnp.zeros((NUM_OUT, 1), jnp.float32),
    )


def multi_detector_forward(image_hwc, params):
    """Equivalent of MultiDetector.forward for an HWC image (cv2 convention, 0..255)."""
    h_in, w_in, _ = image_hwc.shape
    # LongestMaxSize: example config has longest side == TARGET_W (scale == 1).
    # Horizontal half of centered PadIfNeeded (constant 0 BEFORE normalize -> exact);
    # the vertical half + Normalize happen inside the fused kernel.
    pad_w = TARGET_W - w_in
    left = pad_w // 2
    img = image_hwc.astype(jnp.float32)
    if pad_w:
        img = jnp.pad(img, ((0, 0), (left, pad_w - left), (0, 0)))
    # Pure input-format conversion (HWC -> channel-major flat rows); ToTensorV2 glue.
    x_flat = jnp.transpose(img, (2, 0, 1)).reshape(CIN, h_in * TARGET_W)
    top = (TARGET_H - h_in) // 2

    out = _multi_detector_pallas(x_flat, params, rows_in=h_in, top=top)   # (8, H*W)
    out = out.reshape(1, NUM_OUT, TARGET_H, TARGET_W)                     # NCHW, free
    return out[:, :NUM_CLASSES], out[:, NUM_CLASSES:]


# ------------------------------ pure-jnp reference ----------------------------
def _reference_forward(image_hwc, params):
    h_in, w_in, _ = image_hwc.shape
    pad_h, pad_w = TARGET_H - h_in, TARGET_W - w_in
    top, left = pad_h // 2, pad_w // 2
    img = jnp.pad(image_hwc.astype(jnp.float32),
                  ((top, pad_h - top), (left, pad_w - left), (0, 0)))
    img = (img / 255.0 - jnp.array(_MEAN, jnp.float32)) / jnp.array(_STD, jnp.float32)
    x = jnp.transpose(img, (2, 0, 1))
    xp = jnp.pad(x, ((0, 0), (1, 1), (1, 1)))
    cols = [xp[c, ky:ky + TARGET_H, kx:kx + TARGET_W].reshape(-1)
            for ky in range(3) for kx in range(3) for c in range(CIN)]
    patches = jnp.stack(cols, axis=0)                            # (27, H*W)
    h = jnp.maximum(params["w1t"][:, :K_RAW] @ patches + params["b1"], 0.0)
    out = params["wht"] @ h + params["bh"]
    out = out.reshape(1, NUM_OUT, TARGET_H, TARGET_W)
    return out[:, :NUM_CLASSES], out[:, NUM_CLASSES:]


if __name__ == "__main__":
    key = jax.random.PRNGKey(0)
    k_img, _ = jax.random.split(key)

    # Synthetic "cv2 image": HWC, values in [0, 255], longest side == TARGET_W.
    image = jax.random.uniform(k_img, (12, 16, 3), jnp.float32,
                               minval=0.0, maxval=255.0)
    params = init_params(jax.random.PRNGKey(42))

    cls_out, reg_out = jax.jit(multi_detector_forward)(image, params)
    jax.block_until_ready((cls_out, reg_out))

    assert cls_out.shape == (1, NUM_CLASSES, TARGET_H, TARGET_W)
    assert reg_out.shape == (1, 4, TARGET_H, TARGET_W)

    cls_ref, reg_ref = _reference_forward(image, params)
    assert bool(jnp.allclose(cls_out, cls_ref, atol=3e-2, rtol=3e-2))
    assert bool(jnp.allclose(reg_out, reg_ref, atol=3e-2, rtol=3e-2))
    print("KERNEL_OK")
</pallas_src>

<mosaic_0001>
module attributes {stable_mosaic.version = 11 : i64} {
  func.func @_fused_detector_kernel(%arg0: memref<3x192xf32, #tpu.memory_space<vmem>>, %arg1: memref<32x32xf32, #tpu.memory_space<vmem>>, %arg2: memref<32x1xf32, #tpu.memory_space<vmem>>, %arg3: memref<8x32xf32, #tpu.memory_space<vmem>>, %arg4: memref<8x1xf32, #tpu.memory_space<vmem>>, %arg5: memref<8x256xf32, #tpu.memory_space<vmem>>, %arg6: memref<3x320xf32, #tpu.memory_space<vmem>>, %arg7: memref<32x256xf32, #tpu.memory_space<vmem>>) attributes {dimension_semantics = [], scalar_prefetch = 0 : i64, scratch_operands = 2 : i64, tpu.core_type = #tpu.core_type<tc>} {
    %0 = tpu.iota {dimensions = array<i32: 0>} : vector<3x320xi32>
    %1 = tpu.iota {dimensions = array<i32: 1>} : vector<3x320xi32>
    %c32_i32 = arith.constant 32 : i32
    %2 = vector.broadcast %c32_i32 : i32 to vector<3x320xi32>
    %3 = arith.subi %1, %2 : vector<3x320xi32>
    %c0_i32 = arith.constant 0 : i32
    %4 = vector.broadcast %c0_i32 : i32 to vector<3x320xi32>
    %5 = arith.cmpi sge, %3, %4 : vector<3x320xi32>
    %c256_i32 = arith.constant 256 : i32
    %6 = vector.broadcast %c256_i32 : i32 to vector<3x320xi32>
    %7 = arith.cmpi slt, %3, %6 : vector<3x320xi32>
    %8 = arith.andi %5, %7 : vector<3x320xi1>
    %c0_i32_0 = arith.constant 0 : i32
    %9 = vector.broadcast %c0_i32_0 : i32 to vector<3x320xi32>
    %10 = arith.cmpi eq, %0, %9 : vector<3x320xi32>
    %c1_i32 = arith.constant 1 : i32
    %11 = vector.broadcast %c1_i32 : i32 to vector<3x320xi32>
    %12 = arith.cmpi eq, %0, %11 : vector<3x320xi32>
    %cst = arith.constant -2.03571439 : f32
    %cst_1 = arith.constant -1.80444443 : f32
    %13 = vector.broadcast %cst : f32 to vector<3x320xf32>
    %14 = vector.broadcast %cst_1 : f32 to vector<3x320xf32>
    %15 = arith.select %12, %13, %14 : vector<3x320xi1>, vector<3x320xf32>
    %cst_2 = arith.constant -2.11790395 : f32
    %16 = vector.broadcast %cst_2 : f32 to vector<3x320xf32>
    %17 = arith.select %10, %16, %15 : vector<3x320xi1>, vector<3x320xf32>
    %cst_3 = arith.constant 0.000000e+00 : f32
    %18 = vector.broadcast %cst_3 : f32 to vector<3x320xf32>
    %19 = arith.select %8, %17, %18 : vector<3x320xi1>, vector<3x320xf32>
    %c0 = arith.constant 0 : index
    %c0_4 = arith.constant 0 : index
    %20 = vector.load %arg6[%c0, %c0_4] : memref<3x320xf32, #tpu.memory_space<vmem>>, vector<3x320xf32>
    tpu.vector_store %arg6[%c0, %c0_4], %19 {strides = array<i32>} : memref<3x320xf32, #tpu.memory_space<vmem>>, vector<3x320xf32>,
    %21 = tpu.iota {dimensions = array<i32: 0>} : vector<3x192xi32>
    %c0_5 = arith.constant 0 : index
    %c0_6 = arith.constant 0 : index
    %22 = vector.load %arg0[%c0_5, %c0_6] : memref<3x192xf32, #tpu.memory_space<vmem>>, vector<3x192xf32>
    %c0_i32_7 = arith.constant 0 : i32
    %23 = vector.broadcast %c0_i32_7 : i32 to vector<3x192xi32>
    %24 = arith.cmpi eq, %21, %23 : vector<3x192xi32>
    %c1_i32_8 = arith.constant 1 : i32
    %25 = vector.broadcast %c1_i32_8 : i32 to vector<3x192xi32>
    %26 = arith.cmpi eq, %21, %25 : vector<3x192xi32>
    %cst_9 = arith.constant 0.0175070036 : f32
    %cst_10 = arith.constant 0.0174291935 : f32
    %27 = vector.broadcast %cst_9 : f32 to vector<3x192xf32>
    %28 = vector.broadcast %cst_10 : f32 to vector<3x192xf32>
    %29 = arith.select %26, %27, %28 : vector<3x192xi1>, vector<3x192xf32>
    %cst_11 = arith.constant 0.0171247534 : f32
    %30 = vector.broadcast %cst_11 : f32 to vector<3x192xf32>
    %31 = arith.select %24, %30, %29 : vector<3x192xi1>, vector<3x192xf32>
    %32 = arith.mulf %22, %31 : vector<3x192xf32>
    %c0_i32_12 = arith.constant 0 : i32
    %33 = vector.broadcast %c0_i32_12 : i32 to vector<3x192xi32>
    %34 = arith.cmpi eq, %21, %33 : vector<3x192xi32>
    %c1_i32_13 = arith.constant 1 : i32
    %35 = vector.broadcast %c1_i32_13 : i32 to vector<3x192xi32>
    %36 = arith.cmpi eq, %21, %35 : vector<3x192xi32>
    %cst_14 = arith.constant -2.03571439 : f32
    %cst_15 = arith.constant -1.80444443 : f32
    %37 = vector.broadcast %cst_14 : f32 to vector<3x192xf32>
    %38 = vector.broadcast %cst_15 : f32 to vector<3x192xf32>
    %39 = arith.select %36, %37, %38 : vector<3x192xi1>, vector<3x192xf32>
    %cst_16 = arith.constant -2.11790395 : f32
    %40 = vector.broadcast %cst_16 : f32 to vector<3x192xf32>
    %41 = arith.select %34, %40, %39 : vector<3x192xi1>, vector<3x192xf32>
    %42 = arith.addf %32, %41 : vector<3x192xf32>
    %c0_17 = arith.constant 0 : index
    %c64 = arith.constant 64 : index
    %43 = vector.load %arg6[%c0_17, %c64] : memref<3x320xf32, #tpu.memory_space<vmem>>, vector<3x192xf32>
    tpu.vector_store %arg6[%c0_17, %c64], %42 {strides = array<i32>} : memref<3x320xf32, #tpu.memory_space<vmem>>, vector<3x192xf32>,
    %cst_18 = arith.constant 0.000000e+00 : f32
    %44 = vector.broadcast %cst_18 : f32 to vector<5x256xf32>
    %c27 = arith.constant 27 : index
    %c0_19 = arith.constant 0 : index
    %45 = vector.load %arg7[%c27, %c0_19] : memref<32x256xf32, #tpu.memory_space<vmem>>, vector<5x256xf32>
    tpu.vector_store %arg7[%c27, %c0_19], %44 {strides = array<i32>} : memref<32x256xf32, #tpu.memory_space<vmem>>, vector<5x256xf32>,
    %46 = tpu.iota {dimensions = array<i32: 1>} : vector<3x256xi32>
    %c15_i32 = arith.constant 15 : i32
    %47 = vector.broadcast %c15_i32 : i32 to vector<3x256xi32>
    %48 = arith.andi %46, %47 : vector<3x256xi32>
    %c1_i32_20 = arith.constant 1 : i32
    %49 = vector.broadcast %c1_i32_20 : i32 to vector<3x256xi32>
    %50 = arith.cmpi sge, %48, %49 : vector<3x256xi32>
    %c15_i32_21 = arith.constant 15 : i32
    %51 = vector.broadcast %c15_i32_21 : i32 to vector<3x256xi32>
    %52 = arith.cmpi slt, %48, %51 : vector<3x256xi32>
    %c0_22 = arith.constant 0 : index
    %c15 = arith.constant 15 : index
    %53 = vector.load %arg6[%c0_22, %c15] : memref<3x320xf32, #tpu.memory_space<vmem>>, vector<3x256xf32>
    %cst_23 = arith.constant 0.000000e+00 : f32
    %54 = vector.broadcast %cst_23 : f32 to vector<3x256xf32>
    %55 = arith.select %50, %53, %54 : vector<3x256xi1>, vector<3x256xf32>
    %c0_24 = arith.constant 0 : index
    %c0_25 = arith.constant 0 : index
    %56 = vector.load %arg7[%c0_24, %c0_25] : memref<32x256xf32, #tpu.memory_space<vmem>>, vector<3x256xf32>
    tpu.vector_store %arg7[%c0_24, %c0_25], %55 {strides = array<i32>} : memref<32x256xf32, #tpu.memory_space<vmem>>, vector<3x256xf32>,
    %c0_26 = arith.constant 0 : index
    %c16 = arith.constant 16 : index
    %57 = vector.load %arg6[%c0_26, %c16] : memref<3x320xf32, #tpu.memory_space<vmem>>, vector<3x256xf32>
    %c3 = arith.constant 3 : index
    %c0_27 = arith.constant 0 : index
    %58 = vector.load %arg7[%c3, %c0_27] : memref<32x256xf32, #tpu.memory_space<vmem>>, vector<3x256xf32>
    tpu.vector_store %arg7[%c3, %c0_27], %57 {strides = array<i32>} : memref<32x256xf32, #tpu.memory_space<vmem>>, vector<3x256xf32>,
    %c0_28 = arith.constant 0 : index
    %c17 = arith.constant 17 : index
    %59 = vector.load %arg6[%c0_28, %c17] : memref<3x320xf32, #tpu.memory_space<vmem>>, vector<3x256xf32>
    %cst_29 = arith.constant 0.000000e+00 : f32
    %60 = vector.broadcast %cst_29 : f32 to vector<3x256xf32>
    %61 = arith.select %52, %59, %60 : vector<3x256xi1>, vector<3x256xf32>
    %c6 = arith.constant 6 : index
    %c0_30 = arith.constant 0 : index
    %62 = vector.load %arg7[%c6, %c0_30] : memref<32x256xf32, #tpu.memory_space<vmem>>, vector<3x256xf32>
    tpu.vector_store %arg7[%c6, %c0_30], %61 {strides = array<i32>} : memref<32x256xf32, #tpu.memory_space<vmem>>, vector<3x256xf32>,
    %c0_31 = arith.constant 0 : index
    %c31 = arith.constant 31 : index
    %63 = vector.load %arg6[%c0_31, %c31] : memref<3x320xf32, #tpu.memory_space<vmem>>, vector<3x256xf32>
    %cst_32 = arith.constant 0.000000e+00 : f32
    %64 = vector.broadcast %cst_32 : f32 to vector<3x256xf32>
    %65 = arith.select %50, %63, %64 : vector<3x256xi1>, vector<3x256xf32>
    %c9 = arith.constant 9 : index
    %c0_33 = arith.constant 0 : index
    %66 = vector.load %arg7[%c9, %c0_33] : memref<32x256xf32, #tpu.memory_space<vmem>>, vector<3x256xf32>
    tpu.vector_store %arg7[%c9, %c0_33], %65 {strides = array<i32>} : memref<32x256xf32, #tpu.memory_space<vmem>>, vector<3x256xf32>,
    %c0_34 = arith.constant 0 : index
    %c32 = arith.constant 32 : index
    %67 = vector.load %arg6[%c0_34, %c32] : memref<3x320xf32, #tpu.memory_space<vmem>>, vector<3x256xf32>
    %c12 = arith.constant 12 : index
    %c0_35 = arith.constant 0 : index
    %68 = vector.load %arg7[%c12, %c0_35] : memref<32x256xf32, #tpu.memory_space<vmem>>, vector<3x256xf32>
    tpu.vector_store %arg7[%c12, %c0_35], %67 {strides = array<i32>} : memref<32x256xf32, #tpu.memory_space<vmem>>, vector<3x256xf32>,
    %c0_36 = arith.constant 0 : index
    %c33 = arith.constant 33 : index
    %69 = vector.load %arg6[%c0_36, %c33] : memref<3x320xf32, #tpu.memory_space<vmem>>, vector<3x256xf32>
    %cst_37 = arith.constant 0.000000e+00 : f32
    %70 = vector.broadcast %cst_37 : f32 to vector<3x256xf32>
    %71 = arith.select %52, %69, %70 : vector<3x256xi1>, vector<3x256xf32>
    %c15_38 = arith.constant 15 : index
    %c0_39 = arith.constant 0 : index
    %72 = vector.load %arg7[%c15_38, %c0_39] : memref<32x256xf32, #tpu.memory_space<vmem>>, vector<3x256xf32>
    tpu.vector_store %arg7[%c15_38, %c0_39], %71 {strides = array<i32>} : memref<32x256xf32, #tpu.memory_space<vmem>>, vector<3x256xf32>,
    %c0_40 = arith.constant 0 : index
    %c47 = arith.constant 47 : index
    %73 = vector.load %arg6[%c0_40, %c47] : memref<3x320xf32, #tpu.memory_space<vmem>>, vector<3x256xf32>
    %cst_41 = arith.constant 0.000000e+00 : f32
    %74 = vector.broadcast %cst_41 : f32 to vector<3x256xf32>
    %75 = arith.select %50, %73, %74 : vector<3x256xi1>, vector<3x256xf32>
    %c18 = arith.constant 18 : index
    %c0_42 = arith.constant 0 : index
    %76 = vector.load %arg7[%c18, %c0_42] : memref<32x256xf32, #tpu.memory_space<vmem>>, vector<3x256xf32>
    tpu.vector_store %arg7[%c18, %c0_42], %75 {strides = array<i32>} : memref<32x256xf32, #tpu.memory_space<vmem>>, vector<3x256xf32>,
    %c0_43 = arith.constant 0 : index
    %c48 = arith.constant 48 : index
    %77 = vector.load %arg6[%c0_43, %c48] : memref<3x320xf32, #tpu.memory_space<vmem>>, vector<3x256xf32>
    %c21 = arith.constant 21 : index
    %c0_44 = arith.constant 0 : index
    %78 = vector.load %arg7[%c21, %c0_44] : memref<32x256xf32, #tpu.memory_space<vmem>>, vector<3x256xf32>
    tpu.vector_store %arg7[%c21, %c0_44], %77 {strides = array<i32>} : memref<32x256xf32, #tpu.memory_space<vmem>>, vector<3x256xf32>,
    %c0_45 = arith.constant 0 : index
    %c49 = arith.constant 49 : index
    %79 = vector.load %arg6[%c0_45, %c49] : memref<3x320xf32, #tpu.memory_space<vmem>>, vector<3x256xf32>
    %cst_46 = arith.constant 0.000000e+00 : f32
    %80 = vector.broadcast %cst_46 : f32 to vector<3x256xf32>
    %81 = arith.select %52, %79, %80 : vector<3x256xi1>, vector<3x256xf32>
    %c24 = arith.constant 24 : index
    %c0_47 = arith.constant 0 : index
    %82 = vector.load %arg7[%c24, %c0_47] : memref<32x256xf32, #tpu.memory_space<vmem>>, vector<3x256xf32>
    tpu.vector_store %arg7[%c24, %c0_47], %81 {strides = array<i32>} : memref<32x256xf32, #tpu.memory_space<vmem>>, vector<3x256xf32>,
    %c0_48 = arith.constant 0 : index
    %c0_49 = arith.constant 0 : index
    %83 = vector.load %arg1[%c0_48, %c0_49] : memref<32x32xf32, #tpu.memory_space<vmem>>, vector<32x32xf32>
    %c0_50 = arith.constant 0 : index
    %c0_51 = arith.constant 0 : index
    %84 = vector.load %arg7[%c0_50, %c0_51] : memref<32x256xf32, #tpu.memory_space<vmem>>, vector<32x256xf32>
    %cst_52 = arith.constant dense<0.000000e+00> : vector<32x256xf32>
    %85 = tpu.matmul %83, %84, %cst_52 {dimension_numbers = #tpu.dot_dimension_numbers<[1], [0], [0], [1], [0, 0, 1, 1], [], []>} : vector<32x32xf32>, vector<32x256xf32>, vector<32x256xf32> -> vector<32x256xf32>
    %c0_53 = arith.constant 0 : index
    %c0_54 = arith.constant 0 : index
    %86 = vector.load %arg2[%c0_53, %c0_54] : memref<32x1xf32, #tpu.memory_space<vmem>>, vector<32x1xf32>
    %87 = vector.broadcast %86 : vector<32x1xf32> to vector<32x256xf32>
    %88 = arith.addf %85, %87 : vector<32x256xf32>
    %cst_55 = arith.constant 0.000000e+00 : f32
    %89 = vector.broadcast %cst_55 : f32 to vector<32x256xf32>
    %90 = arith.maximumf %88, %89 : vector<32x256xf32>
    %c0_56 = arith.constant 0 : index
    %c0_57 = arith.constant 0 : index
    %91 = vector.load %arg3[%c0_56, %c0_57] : memref<8x32xf32, #tpu.memory_space<vmem>>, vector<8x32xf32>
    %cst_58 = arith.constant dense<0.000000e+00> : vector<8x256xf32>
    %92 = tpu.matmul %91, %90, %cst_58 {dimension_numbers = #tpu.dot_dimension_numbers<[1], [0], [0], [1], [0, 0, 1, 1], [], []>} : vector<8x32xf32>, vector<32x256xf32>, vector<8x256xf32> -> vector<8x256xf32>
    %c0_59 = arith.constant 0 : index
    %c0_60 = arith.constant 0 : index
    %93 = vector.load %arg4[%c0_59, %c0_60] : memref<8x1xf32, #tpu.memory_space<vmem>>, vector<8x1xf32>
    %94 = vector.broadcast %93 : vector<8x1xf32> to vector<8x256xf32>
    %95 = arith.addf %92, %94 : vector<8x256xf32>
    %c0_61 = arith.constant 0 : index
    %c0_62 = arith.constant 0 : index
    %96 = vector.load %arg5[%c0_61, %c0_62] : memref<8x256xf32, #tpu.memory_space<vmem>>, vector<8x256xf32>
    tpu.vector_store %arg5[%c0_61, %c0_62], %95 {strides = array<i32>} : memref<8x256xf32, #tpu.memory_space<vmem>>, vector<8x256xf32>,
    return
  }
}

</mosaic_0001>

<bundles_post_ra>
// kernel: multi_detector_forward.1
= control target key start
LH: loop header
LB: loop body
LE: loop exit
PB: predicated region body
PF: predicated region fallthrough
CT: control target
= control target key end

     0   :  { %v20_v0 = vlaneseq  ;;  %v571_v3 = vmov 839922192   ;;  %v572_v7 = vmov -1.8044444   ;;  %v573_v9 = vmov 0.017429193   ;;  %s755_s0 = inlined_call_operand.vmem [shape: f32[3,192], index: 0, kind: input, shape index: {}]   ;;  %s756_s2 = inlined_call_operand.vmem [shape: f32[32,1], index: 2, kind: input, shape index: {}]   ;;  %s757_s4 = inlined_call_operand.vmem [shape: f32[8,1], index: 4, kind: input, shape index: {}]   ;;  %s758_s1 = inlined_call_operand.vmem [shape: f32[32,32], index: 1, kind: input, shape index: {}]   ;;  %s759_s3 = inlined_call_operand.vmem [shape: f32[8,32], index: 3, kind: input, shape index: {}]   ;;  %s760_s5 = inlined_call_operand.vmem [shape: f32[8,256], index: 5, kind: output, shape index: {}]  }
   0x1   :  { %v57_v4 = vunpack.c.l.s4 %v571_v3  ;;  %vm50_vm2 = vcmask 518144   ;;  %v52_v16 = vld [vmem:[%s755_s0] sm:$0x77]  ;;  %s574_s20 = smov 64   ;;  %s575_s21 = smov 95   ;;  %vm82_vm5 = vcmask 1042944  }
   0x2   :  { %v21_v1 = vshrl.u32 %v20_v0, 7  ;;  %v616_v2 = vand.u32 127, %v20_v0  ;;  %s576_s22 = smov 81   ;;  %s577_s0 = smov 111   ;;  %vm83_vm6 = vcmask 1046532   ;;  %vm79_vm7 = vcmask 523264  }
   0x3   :  { %v58_v6 = vunpack.c.0.s8 %v57_v4  ;;  %s578_s23 = smov 79   ;;  %s579_s24 = smov 97   ;;  %vm84_vm8 = vmor %vm83_vm6, %vm82_vm5  ;;  %v583_v44 = vmov 0.0   ;;  %v585_v61 = vmov 0   ;;  %v318_v62 = vld [vmem:[%s756_s2 + $0x18] sm:$0xff]  ;;  %v317_v63 = vld [vmem:[%s756_s2 + $0x10] sm:$0xff] }
   0x4   :  { %v25_v5 = vadd.s32 256, %v616_v2  ;;  %vm38_vm0 = vcmp.eq.s32.totalorder %v21_v1, 0  ;;  %vm39_vm1 = vcmp.eq.s32.totalorder %v21_v1, 1  ;;  %v536_v11 = vadd.s32 4294967264, %v616_v2  ;;  %s580_s25 = smov 113   ;;  %s581_s26 = smov 80   ;;  %416 = vmatprep.mubr.f32.mxu0 %v583_v44  ;;  %523 = vmatprep.mubr.f32.mxu1 %v583_v44 }
   0x5   :  { %v40_v8 = vsel %vm39_vm1, -2.0357144, %v572_v7  ;;  %v53_v10 = vsel %vm39_vm1, 0.017507004, %v573_v9  ;;  %v61_v15 = vsub.s32 %v58_v6, %v21_v1  ;;  %s582_s27 = smov 96   ;;  %s584_s28 = smov 112   ;;  %559 = vset.pattern.permute.xlu0 %v585_v61  ;;  %560 = vset.pattern.permute.xlu1 %v585_v61 }
   0x6   :  { %v538_v12 = vadd.s32 4294967264, %v25_v5  ;;  %v41_v13 = vsel %vm38_vm0, -2.117904, %v40_v8  ;;  %v54_v14 = vsel %vm38_vm0, 0.017124753, %v53_v10  ;;  %vm29_vm3 = vcmp.ge.s32.totalorder %v536_v11, 0 }
   0x7   :  { %v62_v17 = vrot.slane %v54_v14, %v61_v15  ;;  %v72_v18 = vrot.slane %v41_v13, %v61_v15  ;;  %v42_v19 = vsel %vm29_vm3, %v41_v13, 0.0  ;;  %87 = vst [vmem:[#allocation3 + $0x30] sm:$0xf8] %v583_v44  ;;  %86 = vst [vmem:[#allocation3 + $0x20] sm:$0xf8] %v583_v44  ;;  %v315_v0 = vld [vmem:[%s756_s2] sm:$0xff] }
   0x8   :  { %vm34_vm4 = vcmp.lt.s32.totalorder %v538_v12, 256  ;;  %v47_v21 = vcombine.low %v42_v19, %v41_v13  ;;  %v316_v1 = vld [vmem:[%s756_s2 + $0x8] sm:$0xff]  ;;  %v450_v3 = vld [vmem:[%s757_s4] sm:$0xff]  ;;  %v24_v14 = vadd.s32 128, %v616_v2  ;;  %vm201_vm9 = vcmask 785408  }
   0x9   :  { %v44_v20 = vsel %vm34_vm4, %v41_v13, 0.0  ;;  %v64_v22 = vmul.f32 %v62_v17, %v52_v16  ;;  %v88_v17 = vand.u32 15, %v616_v2  ;;  %vm219_vm10 = vcmask 777216  }
   0xa   :  { %51 = vst.msk [vmem:[#allocation2 + $0x8] sm:$0x7] %vm50_vm2, %v44_v20  ;;  %49 = vst [vmem:[#allocation2] sm:$0x77] %v47_v21  ;;  %vm247_vm13 = vcmask 662528   ;;  %vm146_vm14 = vcmask 908288  }
   0xb   :  { %v74_v23 = vadd.f32 %v72_v18, %v64_v22  ;;  %v89_v18 = vand.u32 15, %v24_v14  ;;  %vm672_vm11 = vcmp.lt.s32.totalorder %v88_v17, 15  ;;  %vm688_vm15 = vcmp.ge.s32.totalorder %v88_v17, 1  ;;  %v304_v22 = vld [vmem:[%s758_s1 + $0x8] sm:$0xff] }
   0xc   :  { %vm294_vm1 = vcmask 646144   ;;  %vm174_vm2 = vcmask 793600   ;;  %vm105_vm3 = vcmask 924672   ;;  %vm276_vm4 = vcmask 654336  }
   0xd   :  { %76 = vrot.lane.b32.xlu0 %v74_v23, %s574_s20  ;;  %vm676_vm12 = vcmp.lt.s32.totalorder %v89_v18, 15  ;;  %vm692_vm0 = vcmp.ge.s32.totalorder %v89_v18, 1  ;;  %vm128_vm5 = vcmask 916480   ;;  %vm339_vm6 = vcmask 261120  }
  0x11   :  { %v209_v24 = vld [vmem:[#allocation2 + $0x8] sm:$0x7] }
  0x12   :  { %v237_v25 = vld [vmem:[#allocation2 + $0x8] sm:$0x7]  ;;  %217 = vrot.lane.b32.xlu1 %v209_v24, %s575_s21 }
  0x13   :  { %245 = vrot.lane.b32.xlu0 %v237_v25, %s576_s22  ;;  %v136_v26 = vld [vmem:[#allocation2 + $0x8] sm:$0x7] }
  0x14   :  { %v284_v27 = vld [vmem:[#allocation2 + $0x8] sm:$0x7] }
  0x15   :  { %v164_v28 = vld [vmem:[#allocation2 + $0x8] sm:$0x7] }
  0x16   :  { %144 = vrot.lane.b32.xlu1 %v136_v26, %s577_s0  ;;  %v95_v29 = vld [vmem:[#allocation2 + $0x8] sm:$0x7] }
  0x17   :  { %292 = vrot.lane.b32.xlu0 %v284_v27, %s578_s23  ;;  %v263_v30 = vld [vmem:[#allocation2 + $0x8] sm:$0x7] }
  0x18   :  { %v269_v31 = vrot.slane %v263_v30, 3  ;;  %v561_v32 = vld [vmem:[#allocation2 + $0x8] ss:$0 sps:$4 sm:$0x77]  }
  0x19   :  { %v115_v54 = vld [vmem:[#allocation2 + $0x8] sm:$0x7] }
  0x1a   :  { %172 = vrot.lane.b32.xlu1 %v164_v28, %s579_s24  ;;  %v121_v58 = vrot.slane %v115_v54, 5 }
  0x1b   :  { %103 = vrot.lane.b32.xlu0 %v95_v29, %s580_s25 }
  0x1e   :  { %274 = vrot.lane.b32.xlu1 %v269_v31, %s581_s26 }
  0x1f   :  { %199 = vrot.lane.b32.xlu0 %v561_v32, %s582_s27 }
  0x7f   :  { %v77_v33 = vpop.permute.xlu0 %76 }
  0x80   :  { %v78_v34 = vrot.slane %v77_v33, 4 }
  0x82   :  { %v80_v35 = vsel %vm79_vm7, %v78_v34, %v77_v33 }
  0x83   :  { %85 = vst.msk [vmem:[#allocation2] sm:$0x77] %vm84_vm8, %v80_v35 }
  0x84   :  { %v218_v4 = vpop.permute.xlu1 %217 }
  0x85   :  { %v246_v5 = vpop.permute.xlu0 %245 }
  0x88   :  { %v145_v6 = vpop.permute.xlu1 %144 }
  0x89   :  { %v293_v7 = vpop.permute.xlu0 %292 }
  0x8a   :  { %v236_v36 = vld [vmem:[#allocation2] sm:$0x77] }
  0x8b   :  { %v208_v37 = vld [vmem:[#allocation2] sm:$0x77]  ;;  %241 = vrot.lane.b32.xlu0 %v236_v36, %s576_s22  ;;  %v240_v45 = vcombine.high %v236_v36, %v236_v36 }
  0x8c   :  { %213 = vrot.lane.b32.xlu1 %v208_v37, %s575_s21  ;;  %v283_v38 = vld [vmem:[#allocation2] sm:$0x77]  ;;  %v212_v42 = vcombine.high %v208_v37, %v208_v37  ;;  %v173_v8 = vpop.permute.xlu1 %172 }
  0x8d   :  { %v135_v39 = vld [vmem:[#allocation2] sm:$0x77]  ;;  %v287_v47 = vcombine.high %v283_v38, %v283_v38  ;;  %v666_v9 = vpop.permute.xlu0 %103 }
  0x8e   :  { %v163_v40 = vld [vmem:[#allocation2] sm:$0x77]  ;;  %v139_v46 = vcombine.high %v135_v39, %v135_v39 }
  0x8f   :  { %140 = vrot.lane.b32.xlu0 %v135_v39, %s577_s0  ;;  %v94_v41 = vld [vmem:[#allocation2] sm:$0x77]  ;;  %v167_v48 = vcombine.high %v163_v40, %v163_v40 }
  0x90   :  { %288 = vrot.lane.b32.xlu1 %v283_v38, %s578_s23  ;;  %v189_v43 = vld [vmem:[#allocation2] sm:$0x77]  ;;  %v98_v50 = vcombine.high %v94_v41, %v94_v41  ;;  %v668_v10 = vpop.permute.xlu1 %274 }
  0x91   :  { %v262_v49 = vld [vmem:[#allocation2] sm:$0x77]  ;;  %v193_v55 = vcombine.low %v189_v43, %v189_v43  ;;  %v200_v11 = vpop.permute.xlu0 %199 }
  0x92   :  { %v267_v51 = vrot.slane %v262_v49, 3  ;;  %v266_v52 = vcombine.high %v262_v49, %v262_v49  ;;  %v114_v53 = vld [vmem:[#allocation2] sm:$0x77] }
  0x93   :  { %99 = vrot.lane.b32.xlu0 %v94_v41, %s580_s25  ;;  %v118_v57 = vcombine.high %v114_v53, %v114_v53  ;;  %v119_v60 = vrot.slane %v114_v53, 5 }
  0x94   :  { %168 = vrot.lane.b32.xlu1 %v163_v40, %s579_s24  ;;  %v268_v56 = vrot.slane %v266_v52, 3 }
  0x95   :  { %v120_v59 = vrot.slane %v118_v57, 5 }
  0x97   :  { %215 = vrot.lane.b32.xlu0 %v212_v42, %s575_s21 }
  0x98   :  { %197 = vrot.lane.b32.xlu1 %v189_v43, %s582_s27 }
  0x9b   :  { %142 = vrot.lane.b32.xlu0 %v139_v46, %s577_s0 }
  0x9c   :  { %243 = vrot.lane.b32.xlu1 %v240_v45, %s576_s22 }
  0x9f   :  { %170 = vrot.lane.b32.xlu0 %v167_v48, %s579_s24 }
  0xa0   :  { %290 = vrot.lane.b32.xlu1 %v287_v47, %s578_s23 }
  0xa3   :  { %270 = vrot.lane.b32.xlu0 %v267_v51, %s581_s26 }
  0xa4   :  { %101 = vrot.lane.b32.xlu1 %v98_v50, %s580_s25 }
  0xa7   :  { %272 = vrot.lane.b32.xlu0 %v268_v56, %s581_s26 }
  0xa8   :  { %195 = vrot.lane.b32.xlu1 %v193_v55, %s582_s27 }
  0xab   :  { %126 = vrot.lane.b32.xlu0 %v121_v58, %s584_s28 }
  0xac   :  { %124 = vrot.lane.b32.xlu1 %v120_v59, %s584_s28 }
  0xaf   :  { %336 = vperm.xlu0 %559, %v318_v62  }
  0xb0   :  { %122 = vrot.lane.b32.xlu1 %v119_v60, %s584_s28 }
  0xb3   :  { %321 = vperm.xlu0 %559, %v315_v0  }
  0xb4   :  { %331 = vperm.xlu1 %560, %v317_v63  }
  0xb8   :  { %326 = vperm.xlu1 %560, %v316_v1  }
  0xbc   :  { %453 = vperm.xlu1 %560, %v450_v3  }
  0xfd   :  { %v242_v13 = vpop.permute.xlu0 %241 }
  0xfe   :  { %v214_v12 = vpop.permute.xlu1 %213 }
 0x101   :  { %v141_v16 = vpop.permute.xlu0 %140 }
 0x102   :  { %v289_v15 = vpop.permute.xlu1 %288 }
 0x105   :  { %v100_v20 = vpop.permute.xlu0 %99 }
 0x106   :  { %v169_v19 = vpop.permute.xlu1 %168 }
 0x109   :  { %v216_v24 = vpop.permute.xlu0 %215 }
 0x10a   :  { %v680_v23 = vpop.permute.xlu1 %197  ;;  %v220_v2 = vsel %vm219_vm10, %v214_v12, %v216_v24  ;;  %v221_v26 = vsel %vm219_vm10, %v216_v24, %v218_v4  ;;  %v306_v24 = vld [vmem:[%s758_s1 + $0x18] sm:$0xff] }
 0x10b   :  { %v203_v25 = vsel %vm201_vm9, %v680_v23, %v200_v11  ;;  %v224_v27 = vsel %vm672_vm11, %v220_v2, 0.0  ;;  %v225_v28 = vsel %vm676_vm12, %v221_v26, 0.0 }
 0x10c   :  { %207 = vst [vmem:[#allocation3 + $0x10] sm:$0x70] %v203_v25  ;;  %v228_v29 = vrot.slane %v224_v27, 1  ;;  %v229_v30 = vrot.slane %v225_v28, 1 }
 0x10d   :  { %v143_v34 = vpop.permute.xlu0 %142 }
 0x10e   :  { %v244_v33 = vpop.permute.xlu1 %243  ;;  %232 = vst [vmem:[#allocation3 + $0x18] ss:$36 sps:$4 sm:$0x83] %v228_v29   ;;  %233 = vst [vmem:[#allocation3 + $0x28] ss:$-20 sps:$4 sm:$0x83] %v229_v30   ;;  %v147_v37 = vsel %vm146_vm14, %v141_v16, %v143_v34  ;;  %v148_v38 = vsel %vm146_vm14, %v143_v34, %v145_v6 }
 0x10f   :  { %v248_v35 = vsel %vm247_vm13, %v242_v13, %v244_v33  ;;  %v249_v36 = vsel %vm247_vm13, %v244_v33, %v246_v5  ;;  %v151_v41 = vsel %vm672_vm11, %v147_v37, 0.0  ;;  %v152_v42 = vsel %vm676_vm12, %v148_v38, 0.0 }
 0x110   :  { %v252_v39 = vsel %vm688_vm15, %v248_v35, 0.0  ;;  %v253_v40 = vsel %vm692_vm0, %v249_v36, 0.0  ;;  %v155_v46 = vrot.slane %v151_v41, 2  ;;  %v156_v47 = vrot.slane %v152_v42, 2 }
 0x111   :  { %v256_v43 = vrot.slane %v252_v39, 6  ;;  %v257_v45 = vrot.slane %v253_v40, 6  ;;  %v171_v49 = vpop.permute.xlu0 %170 }
 0x112   :  { %v291_v48 = vpop.permute.xlu1 %290  ;;  %159 = vst [vmem:[#allocation3 + $0x38] ss:$-44 sps:$4 sm:$0xc1] %v155_v46   ;;  %160 = vst [vmem:[#allocation3 + $0x10] ss:$-12 sps:$4 sm:$0xc1] %v156_v47   ;;  %v175_v52 = vsel %vm174_vm2, %v169_v19, %v171_v49  ;;  %v176_v53 = vsel %vm174_vm2, %v171_v49, %v173_v8 }
 0x113   :  { %260 = vst [vmem:[#allocation3 + $0x18] sm:$0x1c] %v256_v43  ;;  %261 = vst [vmem:[#allocation3 + $0x28] sm:$0x1c] %v257_v45  ;;  %v295_v50 = vsel %vm294_vm1, %v289_v15, %v291_v48  ;;  %v296_v51 = vsel %vm294_vm1, %v291_v48, %v293_v7  ;;  %v179_v56 = vsel %vm688_vm15, %v175_v52, 0.0  ;;  %v180_v57 = vsel %vm692_vm0, %v176_v53, 0.0 }
 0x114   :  { %v299_v54 = vsel %vm672_vm11, %v295_v50, 0.0  ;;  %v300_v55 = vsel %vm676_vm12, %v296_v51, 0.0  ;;  %v183_v58 = vrot.slane %v179_v56, 7  ;;  %v184_v59 = vrot.slane %v180_v57, 7  ;;  %v449_v52 = vld [vmem:[%s759_s3] sm:$0xff] }
 0x115   :  { %301 = vst [vmem:[#allocation3 + $0x20] sm:$0x7] %v299_v54  ;;  %302 = vst [vmem:[#allocation3 + $0x30] sm:$0x7] %v300_v55  ;;  %v271_v61 = vpop.permute.xlu0 %270 }
 0x116   :  { %v102_v60 = vpop.permute.xlu1 %101  ;;  %187 = vst [vmem:[#allocation3 + $0x38] sm:$0xe] %v183_v58  ;;  %188 = vst [vmem:[#allocation3 + $0x10] sm:$0xe] %v184_v59 }
 0x117   :  { %v106_v62 = vsel %vm105_vm3, %v100_v20, %v102_v60  ;;  %v107_v63 = vsel %vm105_vm3, %v102_v60, %v666_v9  ;;  %v303_v20 = vld [vmem:[%s758_s1] sm:$0xff] }
 0x118   :  { %v110_v0 = vsel %vm688_vm15, %v106_v62, 0.0  ;;  %v111_v1 = vsel %vm692_vm0, %v107_v63, 0.0 }
 0x119   :  { %112 = vst [vmem:[#allocation3 + $0x8] sm:$0x7] %v110_v0  ;;  %113 = vst [vmem:[#allocation3] sm:$0x7] %v111_v1  ;;  %v273_v4 = vpop.permute.xlu0 %272 }
 0x11a   :  { %v196_v3 = vpop.permute.xlu1 %195  ;;  %v277_v6 = vsel %vm276_vm4, %v271_v61, %v273_v4  ;;  %v278_v7 = vsel %vm276_vm4, %v273_v4, %v668_v10 }
 0x11b   :  { %v202_v5 = vsel %vm201_vm9, %v196_v3, %v680_v23  ;;  %281 = vst [vmem:[#allocation3 + $0x18] sm:$0xe0] %v277_v6  ;;  %282 = vst [vmem:[#allocation3 + $0x28] sm:$0xe0] %v278_v7  ;;  %v305_v23 = vld [vmem:[%s758_s1 + $0x10] sm:$0xff] }
 0x11c   :  { %206 = vst [vmem:[#allocation3 + $0x38] sm:$0x70] %v202_v5  ;;  %v314_v8 = vld [vmem:[#allocation3 + $0x30] sm:$0xff]  ;;  %v313_v9 = vld [vmem:[#allocation3 + $0x20] sm:$0xff] }
 0x11d   :  { %376 = vmatprep.subr.mxu0 %v314_v8  ;;  %v127_v12 = vpop.permute.xlu0 %126  ;;  %v310_v10 = vld [vmem:[#allocation3 + $0x10] sm:$0xff] }
 0x11e   :  { %v125_v11 = vpop.permute.xlu1 %124  ;;  %377 = vmatpush1.msra.mxu0 %v313_v9 }
 0x11f   :  { %v130_v13 = vsel %vm128_vm5, %v125_v11, %v127_v12 }
 0x120   :  { %134 = vst [vmem:[#allocation3] sm:$0x38] %v130_v13 }
 0x122   :  { %v123_v14 = vpop.permute.xlu1 %122  ;;  %v312_v16 = vld [vmem:[#allocation3 + $0x28] sm:$0xff]  ;;  %v311_v17 = vld [vmem:[#allocation3 + $0x18] sm:$0xff] }
 0x123   :  { %v129_v15 = vsel %vm128_vm5, %v123_v14, %v125_v11  ;;  %378 = vmatprep.subr.mxu0 %v312_v16  ;;  %v309_v18 = vld [vmem:[#allocation3 + $0x38] sm:$0xff] }
 0x124   :  { %133 = vst [vmem:[#allocation3 + $0x8] sm:$0x38] %v129_v15  ;;  %379 = vmatpush1.msra.mxu0 %v311_v17 }
 0x125   :  { %380 = vmatprep.subr.mxu0 %v310_v10 }
 0x126   :  { %381 = vmatpush1.msra.mxu0 %v309_v18 }
 0x127   :  { %v308_v19 = vld [vmem:[#allocation3] sm:$0xff] }
 0x128   :  { %382 = vmatprep.subr.mxu0 %v308_v19 }
 0x12a   :  { %v337_v31 = vpop.permute.xlu0 %336 }
 0x12b   :  { %v307_v21 = vld [vmem:[#allocation3 + $0x8] sm:$0xff] }
 0x12c   :  { %383 = vmatpush1.msra.mxu0 %v307_v21 }
 0x12d   :  { %539 = vmatmul.mubr.msk.f32.vlgmr.msra.gmra.mxu0 %vm339_vm6, %v303_v20 }
 0x12e   :  { %422 = vmatprep.mubr.f32.mxu0 %v583_v44  ;;  %v322_v38 = vpop.permute.xlu0 %321 }
 0x12f   :  { %v332_v29 = vpop.permute.xlu1 %331 }
 0x131   :  { %540 = vmatmul.mubr.msk.f32.gmra.mxu0 %vm339_vm6, %v304_v22 }
 0x132   :  { %428 = vmatprep.mubr.f32.mxu0 %v583_v44 }
 0x133   :  { %v327_v35 = vpop.permute.xlu1 %326 }
 0x135   :  { %541 = vmatmul.mubr.msk.f32.gmra.mxu0 %vm339_vm6, %v305_v23 }
 0x136   :  { %434 = vmatprep.mubr.f32.mxu0 %v583_v44 }
 0x137   :  { %v454_v53 = vpop.permute.xlu1 %453 }
 0x139   :  { %542 = vmatmul.mubr.msk.f32.gmra.mxu0 %vm339_vm6, %v306_v24 }
 0x1ed   :  { %v418_v25 = vpop.f32.mrf.mxu0 }
 0x1ee   :  { %v419_v46 = vadd.f32 %v418_v25, %v322_v38 }
 0x1ef   :  { %v420_v2 = vpop.f32.mrf.mxu0 }
 0x1f0   :  { %v421_v43 = vadd.f32 %v420_v2, %v322_v38  ;;  %v441_v51 = vmax.f32 %v419_v46, 0.0 }
 0x1f1   :  { %v424_v26 = vpop.f32.mrf.mxu0 }
 0x1f2   :  { %v425_v41 = vadd.f32 %v424_v26, %v327_v35  ;;  %v442_v50 = vmax.f32 %v421_v43, 0.0 }
 0x1f3   :  { %v426_v27 = vpop.f32.mrf.mxu0 }
 0x1f4   :  { %v427_v39 = vadd.f32 %v426_v27, %v327_v35  ;;  %v443_v49 = vmax.f32 %v425_v41, 0.0 }
 0x1f5   :  { %v430_v28 = vpop.f32.mrf.mxu0 }
 0x1f6   :  { %v431_v37 = vadd.f32 %v430_v28, %v332_v29  ;;  %v444_v48 = vmax.f32 %v427_v39, 0.0 }
 0x1f7   :  { %v432_v30 = vpop.f32.mrf.mxu0 }
 0x1f8   :  { %v433_v36 = vadd.f32 %v432_v30, %v332_v29  ;;  %v445_v47 = vmax.f32 %v431_v37, 0.0 }
 0x1f9   :  { %v436_v32 = vpop.f32.mrf.mxu0 }
 0x1fa   :  { %v437_v33 = vadd.f32 %v436_v32, %v337_v31  ;;  %v446_v45 = vmax.f32 %v433_v36, 0.0 }
 0x1fb   :  { %v438_v34 = vpop.f32.mrf.mxu0 }
 0x1fc   :  { %v439_v44 = vadd.f32 %v438_v34, %v337_v31  ;;  %v447_v42 = vmax.f32 %v437_v33, 0.0 }
 0x1fe   :  { %v448_v40 = vmax.f32 %v439_v44, 0.0 }
 0x200   :  { %483 = vmatprep.subr.mxu1 %v448_v40 }
 0x201   :  { %484 = vmatpush1.msra.mxu1 %v447_v42 }
 0x202   :  { %485 = vmatprep.subr.mxu1 %v446_v45 }
 0x203   :  { %486 = vmatpush1.msra.mxu1 %v445_v47 }
 0x204   :  { %487 = vmatprep.subr.mxu1 %v444_v48 }
 0x205   :  { %488 = vmatpush1.msra.mxu1 %v443_v49 }
 0x206   :  { %489 = vmatprep.subr.mxu1 %v442_v50 }
 0x207   :  { %490 = vmatpush1.msra.mxu1 %v441_v51 }
 0x208   :  { %543 = vmatmul.mubr.msk.f32.vlgmr.msra.gmra.mxu1 %vm339_vm6, %v449_v52 }
 0x2c8   :  { %v525_v54 = vpop.f32.mrf.mxu1 }
 0x2c9   :  { %v526_v55 = vadd.f32 %v525_v54, %v454_v53 }
 0x2ca   :  { %v527_v56 = vpop.f32.mrf.mxu1 }
 0x2cb   :  { %530 = vst [vmem:[%s760_s5] sm:$0xff] %v526_v55  ;;  %v528_v57 = vadd.f32 %v527_v56, %v454_v53 }
 0x2cd   :  { %531 = vst [vmem:[%s760_s5 + $0x8] sm:$0xff] %v528_v57 }

</bundles_post_ra>
